<compile_context>
chip_gen: v5e
topology: v5e:2x2
jax: 0.10.0
libtpu: 0.0.40
codegen_flags: <defaults>
</compile_context>

<pallas_src>
import functools
import math

import jax
import jax.numpy as jnp
from jax import lax
from jax.experimental import pallas as pl
from jax.experimental.pallas import tpu as pltpu

EPS = 1e-6  # dinov2 LayerNorm eps


# ----------------------------- in-kernel helpers -----------------------------

def _layernorm(x, g, b):
    mu = jnp.mean(x, axis=-1, keepdims=True)
    var = jnp.mean((x - mu) ** 2, axis=-1, keepdims=True)
    return (x - mu) * jax.lax.rsqrt(var + EPS) * g + b


def _gelu_tanh(x):
    # TODO(synk): torch.nn.GELU() uses exact erf; tanh form differs by ~1e-3
    # but moves the transcendental onto the EUP slot.
    c = math.sqrt(2.0 / math.pi)
    return 0.5 * x * (1.0 + jnp.tanh(c * (x + 0.044715 * x * x * x)))


def _vmem_limit_bytes():
    # Per-generation VMEM budget with ~12.5% headroom (v7x: 64 MiB physical ->
    # ~56 MiB; v5e/v6e: 128 MiB -> capped at 112 MiB).
    try:
        cap = int(pltpu.get_tpu_info().vmem_capacity_bytes)
    except Exception:
        cap = 64 * 1024 * 1024
    return max(32 * 1024 * 1024, min(int(cap * 7 // 8), 112 * 1024 * 1024))


# ------------------ patch embed (+CLS, +pos, pad, bf16) kernel -----------------

def _patch_embed_kernel(p_ref, w_ref, b_ref, pos_ref, o_ref, *, n_patches):
    # p_ref: [1, N, C*p*p] bf16, w_ref: [C*p*p, D] bf16, b_ref: [1, D] f32,
    # pos_ref: [T, D] f32 (row 0 already contains cls + pos[0], pad rows = 0).
    tok = jnp.dot(p_ref[0], w_ref[...],
                  preferred_element_type=jnp.float32) + b_ref[...]      # [N, D]
    T, D = o_ref.shape[1], o_ref.shape[2]
    pad_rows = T - 1 - n_patches
    parts = [jnp.zeros((1, D), jnp.float32), tok]
    if pad_rows:
        parts.append(jnp.zeros((pad_rows, D), jnp.float32))
    full = jnp.concatenate(parts, axis=0)                               # [T, D]
    o_ref[0] = (full + pos_ref[...]).astype(o_ref.dtype)


def patch_embed(patches, w_pe, b_pe, pos_cls_pad, *, n_patches):
    """patches [B, N, C*p*p] bf16 -> tokens [B, T_pad, D] bf16 (CLS + pos + pad)."""
    B, N, Cpp = patches.shape
    D = w_pe.shape[1]
    T = pos_cls_pad.shape[0]
    kernel = functools.partial(_patch_embed_kernel, n_patches=n_patches)
    return pl.pallas_call(
        kernel,
        out_shape=jax.ShapeDtypeStruct((B, T, D), jnp.bfloat16),
        grid=(B,),
        in_specs=[pl.BlockSpec((1, N, Cpp), lambda b: (b, 0, 0)),
                  pl.BlockSpec((Cpp, D), lambda b: (0, 0)),
                  pl.BlockSpec((1, D), lambda b: (0, 0)),
                  pl.BlockSpec((T, D), lambda b: (0, 0))],
        out_specs=pl.BlockSpec((1, T, D), lambda b: (b, 0, 0)),
        compiler_params=pltpu.CompilerParams(dimension_semantics=("parallel",)),
    )(patches, w_pe, b_pe, pos_cls_pad)


# ---------------- fused transformer blocks (grid = B/Bt x depth) ---------------

def _vit_blocks_kernel(mask_ref, x_ref,
                       ln1g_ref, ln1b_ref,
                       wqkv_ref, bqkv_ref,
                       wproj_ref, bproj_ref, ls1_ref,
                       ln2g_ref, ln2b_ref,
                       w1_ref, b1_ref, w2_ref, b2_ref, ls2_ref,
                       normg_ref, normb_ref,
                       o_ref, xs_ref,
                       *, num_heads, hidden_chunk):
    d = pl.program_id(1)

    # Load the Bt-row token slab once per batch tile into the f32 residual.
    @pl.when(d == 0)
    def _():
        xs_ref[...] = x_ref[...].astype(jnp.float32)

    Bt, T, D = xs_ref.shape
    H = num_heads
    dh = D // H
    scale = dh ** -0.5
    BtT = Bt * T

    x = xs_ref[...].reshape(BtT, D)                 # f32 residual stream (flat)

    # ---- attention branch (pre-norm), fused QKV matmul ----
    h = _layernorm(x, ln1g_ref[0], ln1b_ref[0]).astype(jnp.bfloat16)    # [BtT, D]
    qkv = jnp.dot(h, wqkv_ref[0],
                  preferred_element_type=jnp.float32) + bqkv_ref[0]     # [BtT, 3D]

    mask = mask_ref[...]                            # [1, T] additive key mask

    # Per (batch-row, head) scores -> only one [T, T] tile live at a time.
    ctx_rows = []
    for b in range(Bt):
        r0 = b * T
        head_ctx = []
        for hi in range(H):
            c0 = hi * dh
            q = (qkv[r0:r0 + T, c0:c0 + dh] * scale).astype(jnp.bfloat16)
            k = qkv[r0:r0 + T, D + c0:D + c0 + dh].astype(jnp.bfloat16)
            v = qkv[r0:r0 + T, 2 * D + c0:2 * D + c0 + dh].astype(jnp.bfloat16)
            s = lax.dot_general(q, k, (((1,), (1,)), ((), ())),
                                preferred_element_type=jnp.float32)     # [T, T]
            s = s + mask
            s = s - jnp.max(s, axis=-1, keepdims=True)
            p = jnp.exp(s)
            p = p * pl.reciprocal(jnp.sum(p, axis=-1, keepdims=True), approx=True)
            head_ctx.append(jnp.dot(p.astype(jnp.bfloat16), v,
                                    preferred_element_type=jnp.float32))  # [T, dh]
        ctx_rows.append(jnp.concatenate(head_ctx, axis=-1))              # [T, D]
    ctx = jnp.concatenate(ctx_rows, axis=0).astype(jnp.bfloat16)         # [BtT, D]

    # Single full-width output projection over the head-concat context.
    attn = jnp.dot(ctx, wproj_ref[0],
                   preferred_element_type=jnp.float32) + bproj_ref[0]
    x = x + ls1_ref[0] * attn                        # LayerScale + residual

    # ---- MLP branch (pre-norm), hidden dim streamed in chunks ----
    hn = _layernorm(x, ln2g_ref[0], ln2b_ref[0]).astype(jnp.bfloat16)
    Dh = w1_ref.shape[-1]
    n_chunks = Dh // hidden_chunk

    def mlp_chunk(i, acc):
        c0 = pl.multiple_of(i * hidden_chunk, hidden_chunk)
        h1 = (jnp.dot(hn, w1_ref[0, :, pl.ds(c0, hidden_chunk)],
                      preferred_element_type=jnp.float32)
              + b1_ref[0, :, pl.ds(c0, hidden_chunk)])
        h1 = _gelu_tanh(h1).astype(jnp.bfloat16)
        return acc + jnp.dot(h1, w2_ref[0, pl.ds(c0, hidden_chunk), :],
                             preferred_element_type=jnp.float32)

    acc = lax.fori_loop(0, n_chunks, mlp_chunk,
                        jnp.zeros((BtT, D), jnp.float32), unroll=True)
    x = x + ls2_ref[0] * (acc + b2_ref[0])

    xs_ref[...] = x.reshape(Bt, T, D)

    # Final LayerNorm fused here; emit only an 8-row slab (CLS in row 0).
    @pl.when(d == pl.num_programs(1) - 1)
    def _():
        head = x.reshape(Bt, T, D)[:, :8, :]
        o_ref[...] = _layernorm(head, normg_ref[...], normb_ref[...]).astype(o_ref.dtype)


def vit_blocks(x_tok, mask, bp, norm_g, norm_b, *, num_heads,
               hidden_chunk=512, batch_tile=None):
    B, T, D = x_tok.shape
    L = bp['ln1_g'].shape[0]
    Dh = bp['w_fc1'].shape[-1]

    Bt = batch_tile if batch_tile is not None else (2 if B % 2 == 0 else 1)
    assert B % Bt == 0
    chunk = hidden_chunk if (Dh % hidden_chunk == 0) else Dh

    order = ['ln1_g', 'ln1_b', 'w_qkv', 'b_qkv', 'w_proj', 'b_proj', 'ls1',
             'ln2_g', 'ln2_b', 'w_fc1', 'b_fc1', 'w_fc2', 'b_fc2', 'ls2']
    args = [bp[name] for name in order]

    def stacked_spec(a):
        nd = a.ndim
        return pl.BlockSpec((1,) + tuple(a.shape[1:]),
                            lambda bt, d, _nd=nd: (d,) + (0,) * (_nd - 1))

    in_specs = [pl.BlockSpec((1, T), lambda bt, d: (0, 0)),
                pl.BlockSpec((Bt, T, D), lambda bt, d: (bt, 0, 0))]
    in_specs += [stacked_spec(a) for a in args]
    in_specs += [pl.BlockSpec((1, D), lambda bt, d: (0, 0)),
                 pl.BlockSpec((1, D), lambda bt, d: (0, 0))]

    kernel = functools.partial(_vit_blocks_kernel, num_heads=num_heads,
                               hidden_chunk=chunk)
    out = pl.pallas_call(
        kernel,
        out_shape=jax.ShapeDtypeStruct((B, 8, D), jnp.float32),
        grid=(B // Bt, L),
        in_specs=in_specs,
        out_specs=pl.BlockSpec((Bt, 8, D), lambda bt, d: (bt, 0, 0)),
        scratch_shapes=[pltpu.VMEM((Bt, T, D), jnp.float32)],
        compiler_params=pltpu.CompilerParams(
            dimension_semantics=("parallel", "arbitrary"),
            vmem_limit_bytes=_vmem_limit_bytes()),
    )(mask, x_tok, *args, norm_g, norm_b)
    return out[:, 0, :]    # normalized CLS features [B, D]


# ----------------------------- parameter setup --------------------------------

def init_params(key, *, in_chans, patch, embed_dim, depth, num_heads, mlp_ratio,
                num_patches):
    D = embed_dim
    Dh = mlp_ratio * D
    L = depth
    std = 0.02
    keys = jax.random.split(key, 4)

    def nrm(k, shape):
        return jax.random.normal(k, shape, jnp.float32) * std

    params = {
        # Conv2d(in_chans, D, kernel=patch, stride=patch) as matmul:
        # weight [D, C, p, p] -> [C*p*p, D]   (bf16 weights, f32 bias)
        'w_pe': nrm(keys[0], (in_chans * patch * patch, D)).astype(jnp.bfloat16),
        'b_pe': jnp.zeros((1, D), jnp.float32),
        'cls': nrm(keys[1], (1, 1, D)),
        'pos': nrm(keys[2], (1, 1 + num_patches, D)),
        'norm_g': jnp.ones((1, D), jnp.float32),
        'norm_b': jnp.zeros((1, D), jnp.float32),
    }

    bk = jax.random.split(keys[3], 4)
    # Per-block params stacked along a leading depth axis so a single
    # pallas_call can index them with the depth grid coordinate.
    # QKV fused as [L, D, 3D] (= torch qkv.weight.T); proj as [L, D, D].
    params['blocks'] = dict(
        ln1_g=jnp.ones((L, 1, D), jnp.float32),
        ln1_b=jnp.zeros((L, 1, D), jnp.float32),
        w_qkv=nrm(bk[0], (L, D, 3 * D)).astype(jnp.bfloat16),
        b_qkv=jnp.zeros((L, 1, 3 * D), jnp.float32),
        w_proj=nrm(bk[1], (L, D, D)).astype(jnp.bfloat16),
        b_proj=jnp.zeros((L, 1, D), jnp.float32),
        ls1=jnp.ones((L, 1, D), jnp.float32),   # LayerScale (hub init_values=1.0)
        ln2_g=jnp.ones((L, 1, D), jnp.float32),
        ln2_b=jnp.zeros((L, 1, D), jnp.float32),
        w_fc1=nrm(bk[2], (L, D, Dh)).astype(jnp.bfloat16),
        b_fc1=jnp.zeros((L, 1, Dh), jnp.float32),
        w_fc2=nrm(bk[3], (L, Dh, D)).astype(jnp.bfloat16),
        b_fc2=jnp.zeros((L, 1, D), jnp.float32),
        ls2=jnp.ones((L, 1, D), jnp.float32),
    )
    return params


# ------------------------------- forward pass ---------------------------------

def forensics_transformer_forward(x, params, *, patch, num_heads):
    """x: [B, C, H, W] float32 (NCHW). Returns normalized CLS token [B, D] f32."""
    B, C, Hh, Ww = x.shape
    hp, wp = Hh // patch, Ww // patch
    N = hp * wp
    Cpp = C * patch * patch
    D = params['w_pe'].shape[1]

    # Patch extraction (layout glue): NCHW -> [B, N, C*p*p], (C, p, p) order to
    # match PyTorch Conv2d weight layout.
    patches = x.reshape(B, C, hp, patch, wp, patch)
    patches = patches.transpose(0, 2, 4, 1, 3, 5).reshape(B, N, Cpp)
    patches = patches.astype(jnp.bfloat16)

    t_valid = 1 + N
    T = ((t_valid + 7) // 8) * 8

    # Weight-side prep: fold CLS into pos row 0, zero-pad pos to T rows.
    # TODO(synk): DINOv2 bicubically interpolates pos_embed when H/W differ from
    # the pretraining resolution; here pos is added directly.
    pos = params['pos'][0]
    pos = pos.at[0].add(params['cls'][0, 0])
    pos_cls_pad = jnp.pad(pos, ((0, T - t_valid), (0, 0)))           # [T, D] f32

    # Patch embed kernel: conv-as-matmul + CLS + pos + pad + bf16 cast.
    x_tok = patch_embed(patches, params['w_pe'], params['b_pe'], pos_cls_pad,
                        n_patches=N)                                 # [B, T, D] bf16

    # Additive key mask for padded token columns (built once, [1, T] f32).
    mask = jnp.where(jnp.arange(T)[None, :] < t_valid, 0.0, -1e9).astype(jnp.float32)

    # All transformer blocks + final LayerNorm in one fused Pallas kernel.
    return vit_blocks(x_tok, mask, params['blocks'], params['norm_g'],
                      params['norm_b'], num_heads=num_heads)


# ----------------------------------- main --------------------------------------

if __name__ == "__main__":
    # Small ViT-consistent shapes: batch=2, 3-channel 16x16 image, patch=4
    # -> 16 patches + 1 CLS = 17 tokens (padded to 24), embed_dim=32, 4 heads,
    # 2 blocks, mlp_ratio=4.
    B, C, H, W = 2, 3, 16, 16
    PATCH = 4
    EMBED_DIM = 32
    DEPTH = 2
    HEADS = 4
    MLP_RATIO = 4
    NUM_PATCHES = (H // PATCH) * (W // PATCH)

    key = jax.random.PRNGKey(0)
    k_x, k_p = jax.random.split(key)
    x = jax.random.normal(k_x, (B, C, H, W), jnp.float32)
    params = init_params(k_p, in_chans=C, patch=PATCH, embed_dim=EMBED_DIM,
                         depth=DEPTH, num_heads=HEADS, mlp_ratio=MLP_RATIO,
                         num_patches=NUM_PATCHES)

    out = forensics_transformer_forward(x, params, patch=PATCH, num_heads=HEADS)
    out = jax.block_until_ready(out)
    assert out.shape == (B, EMBED_DIM) and out.dtype == jnp.float32
    assert bool(jnp.all(jnp.isfinite(out)))
    print("KERNEL_OK")
</pallas_src>

<mosaic_0001>
module attributes {stable_mosaic.version = 11 : i64} {
  func.func @_patch_embed_kernel(%arg0: i32, %arg1: memref<1x16x48xbf16, #tpu.memory_space<vmem>>, %arg2: memref<48x32xbf16, #tpu.memory_space<vmem>>, %arg3: memref<1x32xf32, #tpu.memory_space<vmem>>, %arg4: memref<24x32xf32, #tpu.memory_space<vmem>>, %arg5: memref<1x24x32xbf16, #tpu.memory_space<vmem>>) attributes {dimension_semantics = [#tpu.dimension_semantics<parallel>], iteration_bounds = array<i64: 2>, scalar_prefetch = 0 : i64, scratch_operands = 0 : i64, tpu.core_type = #tpu.core_type<tc>, window_params = [{transform_indices = @transform_0, window_bounds = array<i64: 1, 16, 48>}, {pipeline_mode = #tpu.pipeline_mode<synchronous>, transform_indices = @transform_1, window_bounds = array<i64: 48, 32>}, {pipeline_mode = #tpu.pipeline_mode<synchronous>, transform_indices = @transform_2, window_bounds = array<i64: 1, 32>}, {pipeline_mode = #tpu.pipeline_mode<synchronous>, transform_indices = @transform_3, window_bounds = array<i64: 24, 32>}, {transform_indices = @transform_4, window_bounds = array<i64: 1, 24, 32>}]} {
    %c0 = arith.constant 0 : index
    %c0_0 = arith.constant 0 : index
    %c0_1 = arith.constant 0 : index
    %0 = vector.load %arg1[%c0, %c0_0, %c0_1] : memref<1x16x48xbf16, #tpu.memory_space<vmem>>, vector<1x16x48xbf16>
    %1 = vector.shape_cast %0 : vector<1x16x48xbf16> to vector<16x48xbf16>
    %c0_2 = arith.constant 0 : index
    %c0_3 = arith.constant 0 : index
    %2 = vector.load %arg2[%c0_2, %c0_3] : memref<48x32xbf16, #tpu.memory_space<vmem>>, vector<48x32xbf16>
    %cst = arith.constant dense<0.000000e+00> : vector<16x32xf32>
    %3 = tpu.matmul %1, %2, %cst {dimension_numbers = #tpu.dot_dimension_numbers<[1], [0], [0], [1], [0, 0, 1, 1], [], []>} : vector<16x48xbf16>, vector<48x32xbf16>, vector<16x32xf32> -> vector<16x32xf32>
    %c0_4 = arith.constant 0 : index
    %c0_5 = arith.constant 0 : index
    %4 = vector.load %arg3[%c0_4, %c0_5] : memref<1x32xf32, #tpu.memory_space<vmem>>, vector<1x32xf32>
    %5 = vector.broadcast %4 : vector<1x32xf32> to vector<16x32xf32>
    %6 = arith.addf %3, %5 : vector<16x32xf32>
    %cst_6 = arith.constant 0.000000e+00 : f32
    %7 = vector.broadcast %cst_6 : f32 to vector<1x32xf32>
    %cst_7 = arith.constant 0.000000e+00 : f32
    %8 = vector.broadcast %cst_7 : f32 to vector<7x32xf32>
    %9 = tpu.concatenate %7, %6, %8 in 0 : vector<1x32xf32>, vector<16x32xf32>, vector<7x32xf32> -> vector<24x32xf32>
    %c0_8 = arith.constant 0 : index
    %c0_9 = arith.constant 0 : index
    %10 = vector.load %arg4[%c0_8, %c0_9] : memref<24x32xf32, #tpu.memory_space<vmem>>, vector<24x32xf32>
    %11 = arith.addf %9, %10 : vector<24x32xf32>
    %12 = arith.truncf %11 : vector<24x32xf32> to vector<24x32xbf16>
    %c0_10 = arith.constant 0 : index
    %c0_11 = arith.constant 0 : index
    %c0_12 = arith.constant 0 : index
    %13 = vector.load %arg5[%c0_10, %c0_11, %c0_12] : memref<1x24x32xbf16, #tpu.memory_space<vmem>>, vector<1x24x32xbf16>
    %14 = vector.shape_cast %13 : vector<1x24x32xbf16> to vector<24x32xbf16>
    %15 = vector.shape_cast %12 : vector<24x32xbf16> to vector<1x24x32xbf16>
    tpu.vector_store %arg5[%c0_10, %c0_11, %c0_12], %15 {strides = array<i32>} : memref<1x24x32xbf16, #tpu.memory_space<vmem>>, vector<1x24x32xbf16>,
    return
  }
  func.func @transform_0(%arg0: i32) -> (i32, i32, i32) {
    %c0_i32 = arith.constant 0 : i32
    %c0_i32_0 = arith.constant 0 : i32
    %c0_i32_1 = arith.constant 0 : i32
    return %arg0, %c0_i32, %c0_i32_0 : i32, i32, i32
  }
  func.func @transform_1(%arg0: i32) -> (i32, i32) {
    %c0_i32 = arith.constant 0 : i32
    %c0_i32_0 = arith.constant 0 : i32
    %c0_i32_1 = arith.constant 0 : i32
    return %c0_i32, %c0_i32_0 : i32, i32
  }
  func.func @transform_2(%arg0: i32) -> (i32, i32) {
    %c0_i32 = arith.constant 0 : i32
    %c0_i32_0 = arith.constant 0 : i32
    %c0_i32_1 = arith.constant 0 : i32
    return %c0_i32, %c0_i32_0 : i32, i32
  }
  func.func @transform_3(%arg0: i32) -> (i32, i32) {
    %c0_i32 = arith.constant 0 : i32
    %c0_i32_0 = arith.constant 0 : i32
    %c0_i32_1 = arith.constant 0 : i32
    return %c0_i32, %c0_i32_0 : i32, i32
  }
  func.func @transform_4(%arg0: i32) -> (i32, i32, i32) {
    %c0_i32 = arith.constant 0 : i32
    %c0_i32_0 = arith.constant 0 : i32
    %c0_i32_1 = arith.constant 0 : i32
    return %arg0, %c0_i32, %c0_i32_0 : i32, i32, i32
  }
}

</mosaic_0001>

<bundles_post_ra>
// kernel: tpu_custom_call.1
= control target key start
LH: loop header
LB: loop body
LE: loop exit
PB: predicated region body
PF: predicated region fallthrough
CT: control target
= control target key end

     0   :  { %9 = vsyncpa [#allocation3], 0  ;;  %s634_s0 = inlined_call_operand.vmem [shape: bf16[2,16,48], index: 0, kind: input, shape index: {}]   ;;  %s635_s1 = inlined_call_operand.vmem [shape: bf16[48,32], index: 1, kind: input, shape index: {}]   ;;  %s636_s2 = inlined_call_operand.vmem [shape: f32[1,32], index: 2, kind: input, shape index: {}]   ;;  %s637_s3 = inlined_call_operand.vmem [shape: f32[24,32], index: 3, kind: input, shape index: {}]   ;;  %s638_s4 = inlined_call_operand.hbm [shape: bf16[2,24,32], index: 4, kind: output, shape index: {}]  }
   0x1   :  { %11 = vsyncpa [#allocation3 + $0x1], 0  ;;  %s518_s15 = smov 0   ;;  %s520_s16 = smov 0  }
   0x2   :  { %s522_s17 = smov 0   ;;  %s524_s18 = smov 0  }
   0x3 LB: > { %s539_s19 = sadd.s32 4294967295, %s489_s18   ;;  %s352_s20 = sadd.s32 4294967294, %s489_s18   ;;  %s489_s18 = sphi %s524_s18, %s644_s18   ;;  %s485_s17 = sphi %s522_s17, %s643_s17   ;;  %s481_s16 = sphi %s520_s16, %s642_s16   ;;  %s477_s15 = sphi %s518_s15, %s641_s15  }
   0x4   : > { %s543_s21 = sadd.s32 1, %s489_s18   ;;  %s113_s22 = sadd.s32 1, %s485_s17 }
   0x5   : > { %s110_s23 = ssub.s32 %s489_s18, %s543_s21  ;;  %p123_p0 = scmp.ne.s32.totalorder %s485_s17, %s481_s16 }
   0x6   : > { %p111_p1 = scmp.eq.s32.totalorder %s110_s23, 0  ;;  %p124_p2 = scmp.eq.s32.totalorder %s539_s19, 1 }
   0x7   : > { %p129_p3 = scmp.ne.s32.totalorder %s481_s16, %s477_s15  ;;  %p130_p4 = scmp.eq.s32.totalorder %s352_s20, 1 }
   0x8   : > { %s554_s24 = scalar_select %p111_p1, %s485_s17, %s113_s22  }
   0x9   : > { %p556_p5 = por %p124_p2, %p123_p0  ;;  %p560_p6 = por %p130_p4, %p129_p3 }
   0xa   : > { %p355_p7 = scmp.ge.s32.totalorder %s489_s18, 1  ;;  %p165_p8 = scmp.lt.s32.totalorder %s489_s18, 3 }
   0xc   : > { %p166_p9 = pnand %p355_p7, %p165_p8 }
   0xd   : > { %p191_p10 = scmp.lt.s32.totalorder (!%p166_p9), %s539_s19, 1  ;;  %s188_s14 = sand.u32 (!%p166_p9), 1, %s481_s16  }
   0xe   : > { %169 = sbr.rel (%p166_p9) target bundleno = 179 (0xb3), region = 36  ;;  %s447_s23 = scalar_lea.hbm (!%p166_p9), %s638_s4, 24 }
   0xf   : > { %s383_s20 = smul.u32 (!%p166_p9), 12, %s188_s14 }
  0x10   : > { %s384_s27 = smul.u32 (!%p166_p9), 12, %s539_s19 }
  0x11   : > { %s190_s28 = scalar_lea.vmem (!%p166_p9), [#allocation2], %s383_s20 }
  0x13   : > { %v382_v0 = vld [vmem:[%s635_s1 + $0x10] sm:$0xff]  ;;  %v381_v1 = vld [vmem:[%s635_s1 + $0x8] sm:$0xff]  ;;  %s192_s5 = scalar_select %p191_p10, %s539_s19, 1  ;;  %v380_v2 = vld [vmem:[%s635_s1] sm:$0xff]  ;;  %vm232_vm0 = vcmask 392192   ;;  %vm252_vm1 = vcmask 1040384  }
  0x14   : > { %241 = vmatpush.bf16.msra.mxu0 %v382_v0  ;;  %v426_v4 = vld [vmem:[%s636_s2] ss:$0 sm:$0xff]  ;;  %vm270_vm2 = vcmask 257024   ;;  %v262_v15 = vld [vmem:[%s637_s3 + $0x8] sm:$0xff]  ;;  %v263_v16 = vld [vmem:[%s637_s3 + $0x10] sm:$0xff]  ;;  %s287_s19 = sshll.u32 %s190_s28, 4  ;;  %s288_s19 = int_to_ptr.vmem [resolvable:$true] %s287_s19 }
  0x15   : > { %s378_s6 = sshll.u32 %s192_s5, 3  ;;  %v261_v8 = vld [vmem:[%s637_s3] sm:$0xff]  ;;  %s286_s5 = scalar_lea.hbm %s638_s4, %s384_s27 }
  0x16   : > { %s195_s11 = scalar_lea.vmem %s634_s0, %s378_s6  ;;  %s289_s10 = sshll.u32 %s286_s5, 4  ;;  %s290_s10 = int_to_ptr.hbm [resolvable:$true] %s289_s10 }
  0x17   : > { %v379_v3 = vld [vmem:[%s195_s11] sm:$0xff]  ;;  %s275_s11 = scalar_lea.sflag [#allocation3], %s188_s14  ;;  %s441_s12 = sshra.s32 %s290_s10, 4  ;;  %s442_s12 = int_to_ptr.hbm [resolvable:$true] %s441_s12 }
  0x18   : > { %242 = vmatpush.bf16.msra.mxu0 %v381_v1  ;;  %s443_s13 = scalar_lea.hbm %s442_s12, 12  ;;  %p448_p0 = scmp.lt.s32.totalorder %s442_s12, %s638_s4 }
  0x19   : > { %p444_p11 = scmp.ne.s32.totalorder %s442_s12, %s443_s13  ;;  %p449_p1 = scmp.lt.s32.totalorder %s447_s23, %s443_s13 }
  0x1b   : > { %p445_p12 = pnand %p444_p11, %p556_p5  ;;  %p450_p2 = por %p449_p1, %p448_p0 }
  0x1c   : > { %243 = vmatpush.bf16.msra.mxu0 %v380_v2 }
  0x1d   : > { %p446_p13 = pneg %p445_p12 }
  0x1f   : > { %374 = vmatmul.msk.bf16.vlgmr.msra.gmra.mxu0 %vm232_vm0, %v379_v3  ;;  %p451_p3 = pnand %p450_p2, %p446_p13 }
  0x9c   : > { %v245_v5 = vpop.f32.mrf.mxu0 }
  0x9d   : > { %v246_v6 = vadd.f32 %v426_v4, %v245_v5 }
  0x9f   : > { %v253_v7 = vrot.slane %v246_v6, 7 }
  0xa1   : > { %v259_v9 = vsel %vm252_vm1, 0.0, %v253_v7 }
  0xa2   : > { %v264_v10 = vadd.f32 %v261_v8, %v259_v9 }
  0xa4   : > { %v267_v11 = vpack.c.bf16 %v264_v10, %v264_v10  ;;  %v247_v12 = vpop.f32.mrf.mxu0 }
  0xa5   : > { %v248_v13 = vadd.f32 %v426_v4, %v247_v12 }
  0xa6   : > { %271 = vst.msk [vmem:[%s190_s28] sm:$0xf] %vm270_vm2, %v267_v11 }
  0xa7   : > { %v254_v14 = vrot.slane %v248_v13, 7 }
  0xa9   : > { %v255_v17 = vsel %vm252_vm1, %v253_v7, %v254_v14  ;;  %v260_v18 = vsel %vm252_vm1, %v254_v14, 0.0 }
  0xaa   : > { %v265_v19 = vadd.f32 %v262_v15, %v255_v17  ;;  %v266_v20 = vadd.f32 %v263_v16, %v260_v18 }
  0xac   : > { %v268_v21 = vpack.c.bf16 %v265_v19, %v265_v19  ;;  %v269_v22 = vpack.c.bf16 %v266_v20, %v266_v20 }
  0xae   : > { %272 = vst.msk [vmem:[%s190_s28 + $0x4] sm:$0xf] %vm270_vm2, %v268_v21 }
  0xaf   : > { %273 = vst.msk [vmem:[%s190_s28 + $0x8] sm:$0xf] %vm270_vm2, %v269_v22 }
  0xb0   : > { %454 = shalt.err (!%p451_p3)
}
  0xb1   : > { %s491_s14 = smov 64   ;;  %s492_s28 = smov 4  }
  0xb2   : > { %385 = dma.vmem_to_hbm [thread:$0]  (%p556_p5), %s288_s19, 192, %s290_s10, %s275_s11, %s491_s14, %s491_s14, %s492_s28  }
  0xb3 PF: > { %p391_p4 = scmp.ge.s32.totalorder %s489_s18, 2  ;;  %s304_s30 = sand.u32 1, %s477_s15  }
  0xb4   : > { %s305_s5 = scalar_lea.sflag [#allocation3], %s304_s30 }
  0xb5   : > { %p388_p7 = pnand %p391_p4, %p560_p6 }
  0xb7   : > { %p389_p8 = pneg %p388_p7 }
  0xb9   : > { %472 = dma.done.wait (%p389_p8), %s305_s5, 192  }
  0xba   : > { %474 = vsyncadd (%p389_p8), %s305_s5, 4294967104  ;;  %p14_p9 = scmp.ge.s32.totalorder %s543_s21, 4   ;;  %s641_s15 = smov %s481_s16 }
  0xbb   : > { %s642_s16 = smov %s485_s17  ;;  %s643_s17 = smov %s554_s24 }
  0xbc   : > { %s644_s18 = smov %s543_s21  ;;  %16 = sbr.rel (!%p14_p9) target bundleno = 3 (0x3), region = 71 }
  0xc1   :  { %311 = vsyncpa [#allocation3], 1 }
  0xc2   :  { %313 = vsyncpa [#allocation3 + $0x1], 1 }

</bundles_post_ra>
